<compile_context>
chip_gen: v6e
topology: v6e:2x2x1
jax: 0.10.0
libtpu: 0.0.40
codegen_flags: <defaults>
</compile_context>

<pallas_src>
import jax
import jax.numpy as jnp
from jax import lax
from jax.experimental import pallas as pl
from jax.experimental.pallas import tpu as pltpu


def _replica_linear_kernel(x_ref, w_ref, b_ref, o_ref):
    # x_ref: [tm, C_in]   w_ref: [C_out, C_in]   b_ref: [1, C_out] (f32)
    # o_ref: [tm, C_out]
    # Contract the last dim of both operands -> MXU fed directly, no transpose.
    acc = lax.dot_general(
        x_ref[...],
        w_ref[...],
        dimension_numbers=(((1,), (1,)), ((), ())),
        preferred_element_type=jnp.float32,
    )
    o_ref[...] = (acc + b_ref[...]).astype(o_ref.dtype)


def _round_up(x, m):
    return ((x + m - 1) // m) * m


def replica_layer_forward(x, weight, bias, *, tm_cap=8192,
                          vmem_limit_bytes=48 * 1024 * 1024):
    """Forward of ReplicaLayer wrapping nn.Linear.

    x:      [B, T, C_in]
    weight: [C_out, C_in]   (PyTorch nn.Linear convention)
    bias:   [C_out]
    returns [B, T, C_out]
    """
    B, T, C_in = x.shape
    C_out = weight.shape[0]
    M = B * T

    # Activations stay unpadded: (M, C_in) with the last block dim equal to the
    # full array dim satisfies the (8,128) layout constraint.
    x2d = x.reshape(M, C_in)

    # Hoist the bias cast out of the per-step kernel path: store it as f32 2-D.
    b2d = bias.astype(jnp.float32).reshape(1, C_out)

    # --- Tile M ------------------------------------------------------------
    # VMEM per row of a tile: double-buffered x tile + double-buffered out
    # tile (W/b are tiny and resident).  Budget well under the explicit
    # vmem_limit_bytes so the pipeline always fits (v5e/v6e/v7x safe).
    x_b = x.dtype.itemsize
    w_b = weight.dtype.itemsize
    resident = 2 * (C_out * C_in * w_b + C_out * 4)
    per_row = 2 * (C_in * x_b + C_out * x_b)
    budget = vmem_limit_bytes - 8 * 1024 * 1024  # headroom for compiler scratch
    tm_budget = max(8, (budget - resident) // per_row)

    tm = int(min(tm_cap, tm_budget, _round_up(M, 8)))
    tm = max(8, (tm // 8) * 8)  # sublane-aligned

    grid = (pl.cdiv(M, tm),)  # edge block (if any) is padded/masked by Pallas

    out2d = pl.pallas_call(
        _replica_linear_kernel,
        out_shape=jax.ShapeDtypeStruct((M, C_out), x.dtype),
        grid_spec=pltpu.PrefetchScalarGridSpec(
            num_scalar_prefetch=0,
            grid=grid,
            in_specs=[
                # x: tiled over M, double-buffered by the Pallas pipeline.
                pl.BlockSpec((tm, C_in), lambda i: (i, 0)),
                # W and b: resident across the whole grid (constant index_map).
                pl.BlockSpec((C_out, C_in), lambda i: (0, 0)),
                pl.BlockSpec((1, C_out), lambda i: (0, 0)),
            ],
            out_specs=pl.BlockSpec((tm, C_out), lambda i: (i, 0)),
        ),
        compiler_params=pltpu.CompilerParams(
            # Independent M tiles -> shard across v7x's 2 TensorCores; harmless
            # on v5e/v6e (single TC).
            dimension_semantics=("parallel",),
            # Explicit scoped-VMEM limit: above v5e's 16 MiB default, safely
            # under v7x's 64 MiB physical per-TC VMEM.
            vmem_limit_bytes=vmem_limit_bytes,
        ),
        cost_estimate=pl.CostEstimate(
            flops=2 * M * C_in * C_out,
            transcendentals=0,
            bytes_accessed=(M * C_in * x_b          # read x
                            + C_out * C_in * w_b    # read W
                            + C_out * 4             # read b (f32)
                            + M * C_out * x_b),     # write out
        ),
    )(x2d, weight, b2d)

    return out2d.reshape(B, T, C_out)


if __name__ == "__main__":
    key = jax.random.PRNGKey(0)
    k_x, k_w, k_b = jax.random.split(key, 3)

    B, T, C = 2, 8, 32  # small shapes consistent with the module's usage
    x = jax.random.normal(k_x, (B, T, C), dtype=jnp.float32)

    # Deterministic nn.Linear-style init (uniform in [-1/sqrt(C), 1/sqrt(C)]).
    bound = 1.0 / (C ** 0.5)
    weight = jax.random.uniform(k_w, (C, C), jnp.float32, -bound, bound)
    bias = jax.random.uniform(k_b, (C,), jnp.float32, -bound, bound)

    out = replica_layer_forward(x, weight, bias)
    out = jax.block_until_ready(out)

    # Sanity-check against plain JAX reference of the replica's forward.
    ref = x.reshape(B * T, C) @ weight.T + bias
    ref = ref.reshape(B, T, C)
    assert out.shape == ref.shape
    assert jnp.allclose(out, ref, atol=1e-5, rtol=1e-5)

    print("KERNEL_OK")
</pallas_src>

<mosaic_0001>
module attributes {stable_mosaic.version = 11 : i64} {
  func.func @_replica_linear_kernel(%arg0: i32, %arg1: memref<16x32xf32, #tpu.memory_space<vmem>>, %arg2: memref<32x32xf32, #tpu.memory_space<vmem>>, %arg3: memref<1x32xf32, #tpu.memory_space<vmem>>, %arg4: memref<16x32xf32, #tpu.memory_space<vmem>>) attributes {dimension_semantics = [#tpu.dimension_semantics<parallel>], iteration_bounds = array<i64: 1>, scalar_prefetch = 0 : i64, scratch_operands = 0 : i64, tpu.core_type = #tpu.core_type<tc>, window_params = [{transform_indices = @transform_0, window_bounds = array<i64: 16, 32>}, {pipeline_mode = #tpu.pipeline_mode<synchronous>, transform_indices = @transform_1, window_bounds = array<i64: 32, 32>}, {pipeline_mode = #tpu.pipeline_mode<synchronous>, transform_indices = @transform_2, window_bounds = array<i64: 1, 32>}, {transform_indices = @transform_3, window_bounds = array<i64: 16, 32>}]} {
    %c0 = arith.constant 0 : index
    %c0_0 = arith.constant 0 : index
    %0 = vector.load %arg1[%c0, %c0_0] : memref<16x32xf32, #tpu.memory_space<vmem>>, vector<16x32xf32>
    %c0_1 = arith.constant 0 : index
    %c0_2 = arith.constant 0 : index
    %1 = vector.load %arg2[%c0_1, %c0_2] : memref<32x32xf32, #tpu.memory_space<vmem>>, vector<32x32xf32>
    %cst = arith.constant dense<0.000000e+00> : vector<16x32xf32>
    %2 = tpu.matmul %0, %1, %cst {dimension_numbers = #tpu.dot_dimension_numbers<[1], [1], [0], [0], [0, 0, 1, 0], [], []>} : vector<16x32xf32>, vector<32x32xf32>, vector<16x32xf32> -> vector<16x32xf32>
    %c0_3 = arith.constant 0 : index
    %c0_4 = arith.constant 0 : index
    %3 = vector.load %arg3[%c0_3, %c0_4] : memref<1x32xf32, #tpu.memory_space<vmem>>, vector<1x32xf32>
    %4 = vector.broadcast %3 : vector<1x32xf32> to vector<16x32xf32>
    %5 = arith.addf %2, %4 : vector<16x32xf32>
    %c0_5 = arith.constant 0 : index
    %c0_6 = arith.constant 0 : index
    %6 = vector.load %arg4[%c0_5, %c0_6] : memref<16x32xf32, #tpu.memory_space<vmem>>, vector<16x32xf32>
    tpu.vector_store %arg4[%c0_5, %c0_6], %5 {strides = array<i32>} : memref<16x32xf32, #tpu.memory_space<vmem>>, vector<16x32xf32>,
    return
  }
  func.func @transform_0(%arg0: i32) -> (i32, i32) {
    %c0_i32 = arith.constant 0 : i32
    %c0_i32_0 = arith.constant 0 : i32
    return %arg0, %c0_i32 : i32, i32
  }
  func.func @transform_1(%arg0: i32) -> (i32, i32) {
    %c0_i32 = arith.constant 0 : i32
    %c0_i32_0 = arith.constant 0 : i32
    %c0_i32_1 = arith.constant 0 : i32
    return %c0_i32, %c0_i32_0 : i32, i32
  }
  func.func @transform_2(%arg0: i32) -> (i32, i32) {
    %c0_i32 = arith.constant 0 : i32
    %c0_i32_0 = arith.constant 0 : i32
    %c0_i32_1 = arith.constant 0 : i32
    return %c0_i32, %c0_i32_0 : i32, i32
  }
  func.func @transform_3(%arg0: i32) -> (i32, i32) {
    %c0_i32 = arith.constant 0 : i32
    %c0_i32_0 = arith.constant 0 : i32
    return %arg0, %c0_i32 : i32, i32
  }
}

</mosaic_0001>

<bundles_post_ra>
// kernel: tpu_custom_call.1
= control target key start
LH: loop header
LB: loop body
LE: loop exit
PB: predicated region body
PF: predicated region fallthrough
CT: control target
= control target key end

     0   :  { %8 = vsyncpa [#allocation3], 0  ;;  %s323_s0 = inlined_call_operand.hbm [shape: f32[16,32], index: 0, kind: input, shape index: {}]   ;;  %s324_s1 = inlined_call_operand.hbm [shape: f32[32,32], index: 1, kind: input, shape index: {}]   ;;  %s325_s2 = inlined_call_operand.vmem [shape: f32[1,32], index: 2, kind: input, shape index: {}]   ;;  %s326_s3 = inlined_call_operand.hbm [shape: f32[16,32], index: 3, kind: output, shape index: {}]  }
   0x1   :  { %9 = vsyncpa [#allocation6], 0 }
   0x2   :  { %10 = vsyncpa [#allocation4], 0  ;;  %s265_s12 = smov [#allocation2]  }
   0x3   :  { %s16_s13 = sshll.u32 %s265_s12, 4  ;;  %s17_s13 = int_to_ptr.vmem [resolvable:$true] %s16_s13 }
   0x4   :  { %s207_s14 = scalar_lea.vmem %s17_s13, 256  ;;  %p212_p1 = scmp.lt.s32.totalorder %s17_s13, %s17_s13 }
   0x5   :  { %p208_p0 = scmp.ne.s32.totalorder %s17_s13, %s207_s14  ;;  %p213_p2 = scmp.lt.s32.totalorder %s207_s14, %s207_s14 }
   0x7   :  { %p214_p3 = por %p213_p2, %p212_p1 }
   0x9   :  { %p215_p4 = pnand %p214_p3, %p208_p0 }
   0xb   :  { %218 = shalt.err (!%p215_p4)
}
   0xc   :  { %s266_s15 = smov 128   ;;  %s267_s16 = smov 8  }
   0xd   :  { %22 = dma.hbm_to_vmem [thread:$0]  %s323_s0, 256, %s17_s13, [#allocation3], %s266_s15, %s266_s15, %s267_s16  }
   0xe   :  { %s268_s19 = smov [#allocation5]  }
   0xf   :  { %s28_s20 = sshll.u32 %s268_s19, 4  ;;  %s29_s20 = int_to_ptr.vmem [resolvable:$true] %s28_s20 }
  0x10   :  { %s227_s21 = scalar_lea.vmem %s29_s20, 512  ;;  %p232_p6 = scmp.lt.s32.totalorder %s29_s20, %s29_s20 }
  0x11   :  { %p228_p5 = scmp.ne.s32.totalorder %s29_s20, %s227_s21  ;;  %p233_p7 = scmp.lt.s32.totalorder %s227_s21, %s227_s21 }
  0x13   :  { %p234_p8 = por %p233_p7, %p232_p6 }
  0x15   :  { %p235_p9 = pnand %p234_p8, %p228_p5 }
  0x17   :  { %238 = shalt.err (!%p235_p9)
}
  0x18   :  { %34 = dma.hbm_to_vmem [thread:$0]  %s324_s1, 512, %s29_s20, [#allocation6], %s266_s15, %s266_s15, %s267_s16  }
  0x19   :  { %259 = dma.done.wait [#allocation3], 256  }
  0x1a   :  { %260 = vsyncadd [#allocation3], 4294967040 }
  0x1b   :  { %261 = dma.done.wait [#allocation6], 512  }
  0x1c   :  { %262 = vsyncadd [#allocation6], 4294966784  ;;  %vm56_vm0 = vcmask 261120   ;;  %v48_v0 = vld [vmem:[#allocation5 + $0x18] sm:$0xff]  ;;  %v47_v1 = vld [vmem:[#allocation5 + $0x10] sm:$0xff]  ;;  %s269_s24 = smov [#allocation7]  }
  0x1d   :  { %183 = vmatprep.subr.msk.mxu0 %vm56_vm0, %v48_v0  ;;  %v43_v2 = vld [vmem:[#allocation2] sm:$0xff]  ;;  %v46_v3 = vld [vmem:[#allocation5 + $0x8] sm:$0xff]  ;;  %v45_v4 = vld [vmem:[#allocation5] sm:$0xff]  ;;  %s157_s25 = sshll.u32 %s269_s24, 4  ;;  %s158_s25 = int_to_ptr.vmem [resolvable:$true] %s157_s25 }
  0x1e   :  { %184 = vmatpush3.xpose.msk.msra.mxu0 %vm56_vm0, %v48_v0  ;;  %191 = vmatprep.mubr.msk.f32.mxu0 %vm56_vm0, %v43_v2  ;;  %v44_v5 = vld [vmem:[#allocation2 + $0x8] sm:$0xff]  ;;  %v170_v6 = vld [vmem:[%s325_s2] ss:$0 sm:$0xff]  ;;  %s239_s26 = scalar_lea.vmem %s158_s25, 256  ;;  %p244_p11 = scmp.lt.s32.totalorder %s158_s25, %s158_s25 }
  0x1f   :  { %185 = vmatprep.subr.msk.mxu0 %vm56_vm0, %v47_v1  ;;  %p240_p10 = scmp.ne.s32.totalorder %s158_s25, %s239_s26  ;;  %p245_p12 = scmp.lt.s32.totalorder %s239_s26, %s239_s26 }
  0x21   :  { %p246_p13 = por %p245_p12, %p244_p11 }
  0x22   :  { %186 = vmatpush3.xpose.msk.msra.mxu0 %vm56_vm0, %v47_v1 }
  0x23   :  { %187 = vmatprep.subr.msk.mxu0 %vm56_vm0, %v46_v3  ;;  %p247_p0 = pnand %p246_p13, %p240_p10 }
  0x26   :  { %188 = vmatpush3.xpose.msk.msra.mxu0 %vm56_vm0, %v46_v3 }
  0x27   :  { %189 = vmatprep.subr.msk.mxu0 %vm56_vm0, %v45_v4 }
  0x2a   :  { %190 = vmatpush3.xpose.msk.msra.mxu0 %vm56_vm0, %v45_v4 }
  0x2d   :  { %192 = vmatmul.mubr.msk.f32.vlgmr.msra.gmra.mxu0 %vm56_vm0, %v44_v5 }
  0xed   :  { %v193_v7 = vpop.f32.mrf.mxu0 }
  0xee   :  { %v147_v8 = vadd.f32 %v193_v7, %v170_v6 }
  0xef   :  { %v141_v9 = vpop.f32.mrf.mxu0 }
  0xf0   :  { %151 = vst.msk [vmem:[#allocation7 + $0x8] sm:$0xff] %vm56_vm0, %v147_v8  ;;  %v142_v10 = vadd.f32 %v170_v6, %v141_v9 }
  0xf2   :  { %150 = vst.msk [vmem:[#allocation7] sm:$0xff] %vm56_vm0, %v142_v10 }
  0xf3   :  { %250 = shalt.err (!%p247_p0)
}
  0xf4   :  { %163 = dma.vmem_to_hbm [thread:$0]  %s158_s25, 256, %s326_s3, [#allocation4], %s266_s15, %s266_s15, %s267_s16  }
  0xf5   :  { %263 = dma.done.wait [#allocation4], 256  }
  0xf6   :  { %264 = vsyncadd [#allocation4], 4294967040 }
  0xf7   :  { %167 = vsyncpa [#allocation3], 1 }
  0xf8   :  { %168 = vsyncpa [#allocation6], 1 }
  0xf9   :  { %169 = vsyncpa [#allocation4], 1 }

</bundles_post_ra>
